<compile_context>
chip_gen: v7x
topology: tpu7x:2x2x1
jax: 0.10.0
libtpu: 0.0.40
codegen_flags: <defaults>
</compile_context>

<pallas_src>
import jax
import jax.numpy as jnp
from jax.experimental import pallas as pl
from jax.experimental.pallas import tpu as pltpu


def _round_up(n, m):
    return ((n + m - 1) // m) * m


def eiie_output_kernel(x_ref, lw_ref, wbig_ref, wlw_ref, bias_ref, out_ref):
    # x_ref   : (TB, C*H*W)   VMEM  -- lane-dense flattened NCHW batch block
    # lw_ref  : (TB, H)       VMEM  -- previous portfolio weights
    # wbig_ref: (C*H*W, H+1)  VMEM  -- conv weight scattered per coin; col 0 == 0
    # wlw_ref : (H, H+1)      VMEM  -- last_w-channel weight on shifted diagonal; col 0 == 0
    # bias_ref: (1, H+1)      VMEM  -- [0, b, b, ..., b]
    # out_ref : (TB, H+1)     VMEM
    x = x_ref[...].astype(jnp.float32)
    lw = lw_ref[...].astype(jnp.float32)

    # 1x1 conv over the C*W feature channels == one thin MXU matmul.  The zero
    # first weight column produces the exact 0-logit "cash" column directly,
    # so no lane-axis concatenate / shift is needed in the kernel.
    logits = jnp.dot(x, wbig_ref[...], preferred_element_type=jnp.float32)
    logits = logits + jnp.dot(lw, wlw_ref[...], preferred_element_type=jnp.float32)
    logits = logits + bias_ref[...]                       # broadcast (1,H+1) -> (TB,H+1)

    # Exact softmax over the H+1 logits (column 0 is exactly 0).
    m = jnp.max(logits, axis=1, keepdims=True)
    e = jnp.exp(logits - m)
    out_ref[...] = (e / jnp.sum(e, axis=1, keepdims=True)).astype(out_ref.dtype)


def eiie_output_with_w(x, last_w, conv_w, conv_b, *, batch_block=None,
                       vmem_limit_bytes=32 * 1024 * 1024):
    """x: [B, C, H, W] (NCHW), last_w: [B, H], conv_w: [1, C*W+1, 1, 1], conv_b: [1]."""
    B, C, H, W = x.shape
    KW = C * W          # conv input channels coming from x
    K = C * H * W       # flattened feature length per batch row

    # Free metadata reshape (contiguous dims) -> lane-dense 2-D HBM stream.
    # Never downcast in the wrapper; bf16 inputs are streamed as bf16 and
    # upcast inside the kernel.
    x2d = x.reshape(B, K)
    if x2d.dtype not in (jnp.float32, jnp.bfloat16):
        x2d = x2d.astype(jnp.float32)
    lw = last_w
    if lw.dtype not in (jnp.float32, jnp.bfloat16):
        lw = lw.astype(jnp.float32)

    # ---- Fold the 1x1 conv into small matmul weights (K*(H+1) floats) ------
    # PyTorch channel ordering: channel k = c*W + w holds x[:, c, :, w].
    w_vec = conv_w.reshape(KW + 1).astype(jnp.float32)
    w_cw = w_vec[:KW].reshape(C, W)                             # weight for channel c*W+w
    eye = jnp.eye(H, dtype=jnp.float32)
    # wbig[(c*H*W + h*W + w), 1+h'] = w_vec[c*W+w] * (h == h');  column 0 == 0.
    wbig = (w_cw[:, None, :, None] * eye[None, :, None, :]).reshape(K, H)
    wbig = jnp.concatenate([jnp.zeros((K, 1), jnp.float32), wbig], axis=1)        # (K, H+1)
    # last_w channel: wlw[h, 1+h'] = w_last * (h == h');  column 0 == 0.
    wlw = jnp.concatenate([jnp.zeros((H, 1), jnp.float32), w_vec[KW] * eye], axis=1)  # (H, H+1)
    # conv bias on the coin columns, exact 0 on the cash column.
    b_scalar = conv_b.reshape(()).astype(jnp.float32)
    bias_row = jnp.concatenate(
        [jnp.zeros((1, 1), jnp.float32),
         jnp.broadcast_to(b_scalar, (1, H))], axis=1)                              # (1, H+1)

    # ---- Batch block sizing from *padded* VMEM tile bytes -------------------
    if batch_block is None:
        itemsize = jnp.dtype(x2d.dtype).itemsize
        row_bytes = _round_up(K, 128) * itemsize                 # padded bytes per x row in VMEM
        # resident weight / bias tiles (sublane dim -> 8, lane dim -> 128), x2 buffers
        w_bytes = (_round_up(K, 8) + _round_up(H, 8) + 8) * _round_up(H + 1, 128) * 4
        budget = max(1 << 20, int(vmem_limit_bytes * 0.75) - 2 * w_bytes)
        # ~8-16 MiB of x per step, double-buffered: big enough to amortize the
        # ~0.35 us per-step overhead, small enough for v7x's 64 MiB VMEM.
        per_block = min(budget // 2, 12 << 20)
        blk = max(8, (per_block // max(1, row_bytes)) // 8 * 8)
        if B > 8:
            # Keep >=2 grid steps so ("parallel",) can use both v7x TensorCores.
            blk = min(blk, _round_up(pl.cdiv(B, 2), 8))
        batch_block = B if blk >= B else blk
    grid = (pl.cdiv(B, batch_block),)

    return pl.pallas_call(
        eiie_output_kernel,
        out_shape=jax.ShapeDtypeStruct((B, H + 1), jnp.float32),
        grid_spec=pltpu.PrefetchScalarGridSpec(
            num_scalar_prefetch=0,
            grid=grid,
            in_specs=[
                pl.BlockSpec((batch_block, K), lambda i: (i, 0)),
                pl.BlockSpec((batch_block, H), lambda i: (i, 0)),
                pl.BlockSpec((K, H + 1), lambda i: (0, 0)),
                pl.BlockSpec((H, H + 1), lambda i: (0, 0)),
                pl.BlockSpec((1, H + 1), lambda i: (0, 0)),
            ],
            out_specs=pl.BlockSpec((batch_block, H + 1), lambda i: (i, 0)),
        ),
        compiler_params=pltpu.CompilerParams(
            dimension_semantics=("parallel",),       # shards batch across v7x's 2 TCs
            vmem_limit_bytes=vmem_limit_bytes,
        ),
    )(x2d, lw, wbig, wlw, bias_row)


def reference(x, last_w, conv_w, conv_b):
    """Plain-JAX transcription of the PyTorch forward, for verification."""
    B, C, H, W = x.shape
    x_perm = jnp.transpose(x, (0, 1, 3, 2)).reshape(B, C * W, H)[..., None]   # [B, C*W, H, 1]
    lw = last_w.reshape(B, 1, H, 1)
    cat = jnp.concatenate([x_perm, lw], axis=1)                                # [B, C*W+1, H, 1]
    conv = jnp.einsum("oc,bchw->bohw", conv_w.reshape(1, -1), cat,
                      precision="highest") + conv_b.reshape(1, 1, 1, 1)
    logits = jnp.concatenate([jnp.zeros((B, 1), conv.dtype), conv[:, 0, :, 0]], axis=1)
    return jax.nn.softmax(logits, axis=1)


if __name__ == "__main__":
    key = jax.random.PRNGKey(0)
    B, C, H, W = 16, 4, 8, 16          # [batch, features, coins, window] -> 2 grid steps
    k1, k2, k3, k4 = jax.random.split(key, 4)

    x = jax.random.normal(k1, (B, C, H, W), jnp.float32)
    last_w = jax.nn.softmax(jax.random.normal(k2, (B, H), jnp.float32), axis=1)
    conv_w = 0.1 * jax.random.normal(k3, (1, C * W + 1, 1, 1), jnp.float32)    # Conv2d(C*W+1 -> 1, 1x1)
    conv_b = 0.1 * jax.random.normal(k4, (1,), jnp.float32)

    out = eiie_output_with_w(x, last_w, conv_w, conv_b)
    jax.block_until_ready(out)

    ref = reference(x, last_w, conv_w, conv_b)
    assert out.shape == (B, H + 1), out.shape
    # Tolerance covers only MXU f32 accumulation-order differences; the softmax
    # normalization itself is exact (no approx reciprocal), checked below.
    assert jnp.allclose(out, ref, atol=1e-3, rtol=1e-3), float(jnp.max(jnp.abs(out - ref)))
    assert jnp.allclose(jnp.sum(out, axis=1), 1.0, atol=1e-5), "rows must sum to 1"
    print("KERNEL_OK")
</pallas_src>

<mosaic_0001>
module attributes {stable_mosaic.version = 11 : i64} {
  func.func @eiie_output_kernel(%arg0: i32, %arg1: memref<8x512xf32, #tpu.memory_space<vmem>>, %arg2: memref<8x8xf32, #tpu.memory_space<vmem>>, %arg3: memref<512x9xf32, #tpu.memory_space<vmem>>, %arg4: memref<8x9xf32, #tpu.memory_space<vmem>>, %arg5: memref<1x9xf32, #tpu.memory_space<vmem>>, %arg6: memref<8x9xf32, #tpu.memory_space<vmem>>) attributes {dimension_semantics = [#tpu.dimension_semantics<parallel>], iteration_bounds = array<i64: 2>, scalar_prefetch = 0 : i64, scratch_operands = 0 : i64, tpu.core_type = #tpu.core_type<tc>, window_params = [{transform_indices = @transform_0, window_bounds = array<i64: 8, 512>}, {transform_indices = @transform_1, window_bounds = array<i64: 8, 8>}, {pipeline_mode = #tpu.pipeline_mode<synchronous>, transform_indices = @transform_2, window_bounds = array<i64: 512, 9>}, {pipeline_mode = #tpu.pipeline_mode<synchronous>, transform_indices = @transform_3, window_bounds = array<i64: 8, 9>}, {pipeline_mode = #tpu.pipeline_mode<synchronous>, transform_indices = @transform_4, window_bounds = array<i64: 1, 9>}, {transform_indices = @transform_5, window_bounds = array<i64: 8, 9>}]} {
    %c0 = arith.constant 0 : index
    %c0_0 = arith.constant 0 : index
    %0 = vector.load %arg1[%c0, %c0_0] : memref<8x512xf32, #tpu.memory_space<vmem>>, vector<8x512xf32>
    %c0_1 = arith.constant 0 : index
    %c0_2 = arith.constant 0 : index
    %1 = vector.load %arg2[%c0_1, %c0_2] : memref<8x8xf32, #tpu.memory_space<vmem>>, vector<8x8xf32>
    %c0_3 = arith.constant 0 : index
    %c0_4 = arith.constant 0 : index
    %2 = vector.load %arg3[%c0_3, %c0_4] : memref<512x9xf32, #tpu.memory_space<vmem>>, vector<512x9xf32>
    %cst = arith.constant dense<0.000000e+00> : vector<8x9xf32>
    %3 = tpu.matmul %0, %2, %cst {dimension_numbers = #tpu.dot_dimension_numbers<[1], [0], [0], [1], [0, 0, 1, 1], [], []>} : vector<8x512xf32>, vector<512x9xf32>, vector<8x9xf32> -> vector<8x9xf32>
    %c0_5 = arith.constant 0 : index
    %c0_6 = arith.constant 0 : index
    %4 = vector.load %arg4[%c0_5, %c0_6] : memref<8x9xf32, #tpu.memory_space<vmem>>, vector<8x9xf32>
    %cst_7 = arith.constant dense<0.000000e+00> : vector<8x9xf32>
    %5 = tpu.matmul %1, %4, %cst_7 {dimension_numbers = #tpu.dot_dimension_numbers<[1], [0], [0], [1], [0, 0, 1, 1], [], []>} : vector<8x8xf32>, vector<8x9xf32>, vector<8x9xf32> -> vector<8x9xf32>
    %6 = arith.addf %3, %5 : vector<8x9xf32>
    %c0_8 = arith.constant 0 : index
    %c0_9 = arith.constant 0 : index
    %7 = vector.load %arg5[%c0_8, %c0_9] : memref<1x9xf32, #tpu.memory_space<vmem>>, vector<1x9xf32>
    %8 = vector.broadcast %7 : vector<1x9xf32> to vector<8x9xf32>
    %9 = arith.addf %6, %8 : vector<8x9xf32>
    %cst_10 = arith.constant dense<0xFF800000> : vector<8xf32>
    %10 = vector.multi_reduction <maximumf>, %9, %cst_10 [1] : vector<8x9xf32> to vector<8xf32>
    %11 = vector.shape_cast %10 : vector<8xf32> to vector<8x1xf32>
    %12 = vector.broadcast %11 : vector<8x1xf32> to vector<8x9xf32>
    %13 = arith.subf %9, %12 : vector<8x9xf32>
    %14 = math.exp %13 : vector<8x9xf32>
    %cst_11 = arith.constant dense<0.000000e+00> : vector<8xf32>
    %15 = vector.multi_reduction <add>, %14, %cst_11 [1] : vector<8x9xf32> to vector<8xf32>
    %16 = vector.shape_cast %15 : vector<8xf32> to vector<8x1xf32>
    %17 = vector.broadcast %16 : vector<8x1xf32> to vector<8x9xf32>
    %18 = arith.divf %14, %17 : vector<8x9xf32>
    %c0_12 = arith.constant 0 : index
    %c0_13 = arith.constant 0 : index
    %19 = vector.load %arg6[%c0_12, %c0_13] : memref<8x9xf32, #tpu.memory_space<vmem>>, vector<8x9xf32>
    tpu.vector_store %arg6[%c0_12, %c0_13], %18 {strides = array<i32>} : memref<8x9xf32, #tpu.memory_space<vmem>>, vector<8x9xf32>,
    return
  }
  func.func @transform_0(%arg0: i32) -> (i32, i32) {
    %c0_i32 = arith.constant 0 : i32
    %c0_i32_0 = arith.constant 0 : i32
    return %arg0, %c0_i32 : i32, i32
  }
  func.func @transform_1(%arg0: i32) -> (i32, i32) {
    %c0_i32 = arith.constant 0 : i32
    %c0_i32_0 = arith.constant 0 : i32
    return %arg0, %c0_i32 : i32, i32
  }
  func.func @transform_2(%arg0: i32) -> (i32, i32) {
    %c0_i32 = arith.constant 0 : i32
    %c0_i32_0 = arith.constant 0 : i32
    %c0_i32_1 = arith.constant 0 : i32
    return %c0_i32, %c0_i32_0 : i32, i32
  }
  func.func @transform_3(%arg0: i32) -> (i32, i32) {
    %c0_i32 = arith.constant 0 : i32
    %c0_i32_0 = arith.constant 0 : i32
    %c0_i32_1 = arith.constant 0 : i32
    return %c0_i32, %c0_i32_0 : i32, i32
  }
  func.func @transform_4(%arg0: i32) -> (i32, i32) {
    %c0_i32 = arith.constant 0 : i32
    %c0_i32_0 = arith.constant 0 : i32
    %c0_i32_1 = arith.constant 0 : i32
    return %c0_i32, %c0_i32_0 : i32, i32
  }
  func.func @transform_5(%arg0: i32) -> (i32, i32) {
    %c0_i32 = arith.constant 0 : i32
    %c0_i32_0 = arith.constant 0 : i32
    return %arg0, %c0_i32 : i32, i32
  }
}

</mosaic_0001>

<bundles_post_ra>
// kernel: tpu_custom_call.1
= control target key start
LH: loop header
LB: loop body
LE: loop exit
PB: predicated region body
PF: predicated region fallthrough
CT: control target
= control target key end

     0   :  { %10 = vsyncpa [#allocation3], 0  ;;  %s1243_s0 = inlined_call_operand.vmem [shape: f32[16,512], index: 0, kind: input, shape index: {}]   ;;  %s1244_s1 = inlined_call_operand.vmem [shape: f32[16,8], index: 1, kind: input, shape index: {}]   ;;  %s1245_s2 = inlined_call_operand.vmem [shape: f32[512,9], index: 2, kind: input, shape index: {}]   ;;  %s1246_s3 = inlined_call_operand.vmem [shape: f32[8,9], index: 3, kind: input, shape index: {}]   ;;  %s1247_s4 = inlined_call_operand.vmem [shape: f32[1,9], index: 4, kind: input, shape index: {}]   ;;  %s1248_s5 = inlined_call_operand.hbm [shape: f32[16,9], index: 5, kind: output, shape index: {}]  }
   0x1   :  { %12 = vsyncpa [#allocation3 + $0x1], 0  ;;  %s928_s18 = smov 0   ;;  %s930_s19 = smov 0  }
   0x2   :  { %s932_s20 = smov 0   ;;  %s934_s21 = smov 0  }
   0x3 LB: > { %s949_s22 = sadd.s32 4294967295, %s893_s21   ;;  %s630_s23 = sadd.s32 4294967294, %s893_s21   ;;  %s893_s21 = sphi %s934_s21, %s1254_s21   ;;  %s889_s20 = sphi %s932_s20, %s1253_s20   ;;  %s885_s19 = sphi %s930_s19, %s1252_s19   ;;  %s881_s18 = sphi %s928_s18, %s1251_s18  }
   0x4   : > { %s953_s24 = sadd.s32 1, %s893_s21   ;;  %s140_s25 = sadd.s32 1, %s889_s20 }
   0x5   : > { %s137_s26 = ssub.s32 %s893_s21, %s953_s24  ;;  %p150_p0 = scmp.ne.s32.totalorder %s889_s20, %s885_s19 }
   0x6   : > { %p138_p1 = scmp.eq.s32.totalorder %s137_s26, 0  ;;  %p151_p2 = scmp.eq.s32.totalorder %s949_s22, 1 }
   0x7   : > { %p156_p3 = scmp.ne.s32.totalorder %s885_s19, %s881_s18  ;;  %p157_p4 = scmp.eq.s32.totalorder %s630_s23, 1 }
   0x8   : > { %s964_s27 = scalar_select %p138_p1, %s889_s20, %s140_s25  }
   0x9   : > { %p966_p5 = por %p151_p2, %p150_p0  ;;  %p970_p6 = por %p157_p4, %p156_p3 }
   0xa   : > { %p633_p7 = scmp.ge.s32.totalorder %s893_s21, 1  ;;  %p199_p8 = scmp.lt.s32.totalorder %s893_s21, 3 }
   0xc   : > { %p200_p9 = pnand %p633_p7, %p199_p8 }
   0xd   : > { %v261_v0 = vld [vmem:[%s1245_s2 + $0x80] sm:$0xff] (!%p200_p9)  ;;  %v262_v1 = vld [vmem:[%s1245_s2 + $0x88] sm:$0xff] (!%p200_p9)  ;;  %p231_p10 = scmp.lt.s32.totalorder (!%p200_p9), %s949_s22, 1  ;;  %v895_v4 = vmov (!%p200_p9), 0.0   ;;  %vm896_vm0 = vmmov (!%p200_p9), 0   ;;  %v263_v10 = vld [vmem:[%s1245_s2 + $0x90] sm:$0xff] (!%p200_p9) }
   0xe   : > { %203 = sbr.rel (%p200_p9) target bundleno = 605 (0x25d), region = 40  ;;  %v245_v2 = vld [vmem:[%s1245_s2] sm:$0xff] (!%p200_p9)  ;;  %v722_v3 = vpack.c.bf16 (!%p200_p9), %v262_v1, %v261_v0  ;;  %717 = vmatprep.subr.mxu0 (!%p200_p9), %v895_v4  ;;  %v246_v5 = vld [vmem:[%s1245_s2 + $0x8] sm:$0xff] (!%p200_p9)  ;;  %719 = vmatprep.mubr.msk.f32.mxu0 (!%p200_p9), %vm896_vm0, %v895_v4  ;;  %v264_v11 = vld [vmem:[%s1245_s2 + $0x98] sm:$0xff] (!%p200_p9)  ;;  %vm310_vm1 = vcmask (!%p200_p9), 64512   ;;  %vm532_vm2 = vcmask (!%p200_p9), 72704  }
   0xf   : > { %v309_v6 = vld [vmem:[%s1246_s3] sm:$0xff] (!%p200_p9)  ;;  %v724_v8 = vpack.c.bf16 (!%p200_p9), %v246_v5, %v245_v2  ;;  %v294_v9 = vld [vmem:[%s1245_s2 + $0x188] sm:$0xff] (!%p200_p9)  ;;  %v726_v13 = vpack.c.bf16 (!%p200_p9), %v264_v11, %v263_v10  ;;  %v247_v16 = vld [vmem:[%s1245_s2 + $0x10] sm:$0xff] (!%p200_p9)  ;;  %s641_s9 = sshll.u32 (!%p200_p9), %s949_s22, 7 }
  0x10   : > { %v293_v7 = vld [vmem:[%s1245_s2 + $0x180] sm:$0xff] (!%p200_p9)  ;;  %718 = vmatpush3.msra.mxu0 (!%p200_p9), %v309_v6  ;;  %723 = vmatprep.subr.bf16.mxu1 (!%p200_p9), %v722_v3  ;;  %v278_v15 = vld [vmem:[%s1245_s2 + $0x108] sm:$0xff] (!%p200_p9)  ;;  %v248_v18 = vld [vmem:[%s1245_s2 + $0x18] sm:$0xff] (!%p200_p9)  ;;  %s1200_s16 = scalar_lea.hbm (!%p200_p9), %s1248_s5, %s641_s9 }
  0x11   : > { %v754_v12 = vpack.c.bf16 (!%p200_p9), %v294_v9, %v293_v7  ;;  %v277_v14 = vld [vmem:[%s1245_s2 + $0x100] sm:$0xff] (!%p200_p9)  ;;  %725 = vmatpush3.bf16.msra.mxu1 (!%p200_p9), %v724_v8  ;;  %v295_v19 = vld [vmem:[%s1245_s2 + $0x190] sm:$0xff] (!%p200_p9)  ;;  %v296_v20 = vld [vmem:[%s1245_s2 + $0x198] sm:$0xff] (!%p200_p9)  ;;  %v728_v21 = vpack.c.bf16 (!%p200_p9), %v248_v18, %v247_v16 }
  0x12   : > { %v756_v17 = vpack.c.bf16 (!%p200_p9), %v278_v15, %v277_v14  ;;  %727 = vmatprep.subr.bf16.mxu1 (!%p200_p9), %v726_v13  ;;  %v758_v22 = vpack.c.bf16 (!%p200_p9), %v296_v20, %v295_v19  ;;  %v265_v23 = vld [vmem:[%s1245_s2 + $0xa0] sm:$0xff] (!%p200_p9)  ;;  %v266_v24 = vld [vmem:[%s1245_s2 + $0xa8] sm:$0xff] (!%p200_p9)  ;;  %v279_v25 = vld [vmem:[%s1245_s2 + $0x110] sm:$0xff] (!%p200_p9) }
  0x13   : > { %755 = vmatprep.subr.bf16.mxu0 (!%p200_p9), %v754_v12  ;;  %v730_v27 = vpack.c.bf16 (!%p200_p9), %v266_v24, %v265_v23  ;;  %v280_v28 = vld [vmem:[%s1245_s2 + $0x118] sm:$0xff] (!%p200_p9)  ;;  %v249_v29 = vld [vmem:[%s1245_s2 + $0x20] sm:$0xff] (!%p200_p9)  ;;  %v250_v30 = vld [vmem:[%s1245_s2 + $0x28] sm:$0xff] (!%p200_p9) }
  0x14   : > { %v297_v31 = vld [vmem:[%s1245_s2 + $0x1a0] sm:$0xff] (!%p200_p9)  ;;  %v298_v32 = vld [vmem:[%s1245_s2 + $0x1a8] sm:$0xff] (!%p200_p9)  ;;  %v760_v33 = vpack.c.bf16 (!%p200_p9), %v280_v28, %v279_v25  ;;  %v732_v34 = vpack.c.bf16 (!%p200_p9), %v250_v30, %v249_v29  ;;  %v267_v35 = vld [vmem:[%s1245_s2 + $0xb0] sm:$0xff] (!%p200_p9) }
  0x15   : > { %s999_s25 = scalar_select %p231_p10, %s949_s22, 1  ;;  %729 = vmatpush3.bf16.msra.mxu1 %v728_v21  ;;  %v268_v36 = vld [vmem:[%s1245_s2 + $0xb8] sm:$0xff]  ;;  %v281_v37 = vld [vmem:[%s1245_s2 + $0x120] sm:$0xff]  ;;  %v762_v38 = vpack.c.bf16 %v298_v32, %v297_v31  ;;  %v282_v40 = vld [vmem:[%s1245_s2 + $0x128] sm:$0xff] }
  0x16   : > { %731 = vmatprep.subr.bf16.mxu1 %v730_v27  ;;  %v734_v39 = vpack.c.bf16 %v268_v36, %v267_v35  ;;  %v251_v41 = vld [vmem:[%s1245_s2 + $0x30] sm:$0xff]  ;;  %v252_v42 = vld [vmem:[%s1245_s2 + $0x38] sm:$0xff]  ;;  %v269_v45 = vld [vmem:[%s1245_s2 + $0xc0] sm:$0xff]  ;;  %v764_v47 = vpack.c.bf16 %v282_v40, %v281_v37  ;;  %s897_s22 = smov [#allocation2]  }
  0x17   : > { %s637_s14 = sshll.u32 %s999_s25, 3  ;;  %v299_v43 = vld [vmem:[%s1245_s2 + $0x1b0] sm:$0xff]  ;;  %v300_v44 = vld [vmem:[%s1245_s2 + $0x1b8] sm:$0xff]  ;;  %v270_v46 = vld [vmem:[%s1245_s2 + $0xc8] sm:$0xff]  ;;  %v736_v48 = vpack.c.bf16 %v252_v42, %v251_v41  ;;  %s644_s17 = sshll.u32 %s999_s25, 5 }
  0x18   : > { %s239_s8 = scalar_lea.vmem %s1244_s1, %s637_s14  ;;  %v283_v49 = vld [vmem:[%s1245_s2 + $0x130] sm:$0xff]  ;;  %v284_v50 = vld [vmem:[%s1245_s2 + $0x138] sm:$0xff]  ;;  %v766_v51 = vpack.c.bf16 %v300_v44, %v299_v43  ;;  %v738_v52 = vpack.c.bf16 %v270_v46, %v269_v45  ;;  %v253_v53 = vld [vmem:[%s1245_s2 + $0x40] sm:$0xff]  ;;  %s1127_s13 = scalar_lea.vmem %s1243_s0, %s644_s17 }
  0x19   : > { %v244_v26 = vld [vmem:[%s239_s8] sm:$0xff]  ;;  %733 = vmatpush3.bf16.msra.mxu1 %v732_v34  ;;  %v254_v54 = vld [vmem:[%s1245_s2 + $0x48] sm:$0xff]  ;;  %v271_v57 = vld [vmem:[%s1245_s2 + $0xd0] sm:$0xff]  ;;  %v768_v59 = vpack.c.bf16 %v284_v50, %v283_v49  ;;  %s835_s26 = sshll.u32 %s897_s22, 4  ;;  %s836_s26 = int_to_ptr.vmem [resolvable:$false] %s835_s26 }
  0x1a   : > { %720 = vmatmul.mubr.msk.f32.vlgmr.msra.gmra.mrb[0].mxu0 %vm310_vm1, %v244_v26  ;;  %735 = vmatprep.subr.bf16.mxu1 %v734_v39  ;;  %v301_v55 = vld [vmem:[%s1245_s2 + $0x1c0] sm:$0xff]  ;;  %v302_v56 = vld [vmem:[%s1245_s2 + $0x1c8] sm:$0xff]  ;;  %v272_v58 = vld [vmem:[%s1245_s2 + $0xd8] sm:$0xff]  ;;  %v740_v60 = vpack.c.bf16 %v254_v54, %v253_v53  ;;  %s837_s30 = scalar_lea.vmem %s836_s26, 256 }
  0x1b   : > { %757 = vmatpush3.bf16.msra.mxu0 %v756_v17  ;;  %v285_v61 = vld [vmem:[%s1245_s2 + $0x140] sm:$0xff]  ;;  %v286_v62 = vld [vmem:[%s1245_s2 + $0x148] sm:$0xff]  ;;  %v770_v63 = vpack.c.bf16 %v302_v56, %v301_v55  ;;  %v742_v0 = vpack.c.bf16 %v272_v58, %v271_v57  ;;  %v255_v1 = vld [vmem:[%s1245_s2 + $0x50] sm:$0xff] }
  0x1c   : > { %759 = vmatprep.subr.bf16.mxu0 %v758_v22  ;;  %v256_v2 = vld [vmem:[%s1245_s2 + $0x58] sm:$0xff]  ;;  %v303_v3 = vld [vmem:[%s1245_s2 + $0x1d0] sm:$0xff]  ;;  %v273_v5 = vld [vmem:[%s1245_s2 + $0xe0] sm:$0xff]  ;;  %v772_v8 = vpack.c.bf16 %v286_v62, %v285_v61 }
  0x1d   : > { %737 = vmatpush3.bf16.msra.mxu1 %v736_v48  ;;  %v304_v4 = vld [vmem:[%s1245_s2 + $0x1d8] sm:$0xff]  ;;  %v274_v6 = vld [vmem:[%s1245_s2 + $0xe8] sm:$0xff]  ;;  %v287_v7 = vld [vmem:[%s1245_s2 + $0x150] sm:$0xff]  ;;  %v744_v9 = vpack.c.bf16 %v256_v2, %v255_v1 }
  0x1e   : > { %739 = vmatprep.subr.bf16.mxu1 %v738_v52  ;;  %v288_v10 = vld [vmem:[%s1245_s2 + $0x158] sm:$0xff]  ;;  %v257_v11 = vld [vmem:[%s1245_s2 + $0x60] sm:$0xff]  ;;  %v241_v12 = vld [vmem:[%s1127_s13 + $0x8] sm:$0xff]  ;;  %v774_v13 = vpack.c.bf16 %v304_v4, %v303_v3  ;;  %v746_v14 = vpack.c.bf16 %v274_v6, %v273_v5 }
  0x1f   : > { %761 = vmatpush3.bf16.msra.mxu0 %v760_v33  ;;  %v258_v15 = vld [vmem:[%s1245_s2 + $0x68] sm:$0xff]  ;;  %v305_v16 = vld [vmem:[%s1245_s2 + $0x1e0] sm:$0xff]  ;;  %v275_v18 = vld [vmem:[%s1245_s2 + $0xf0] sm:$0xff]  ;;  %448 = vmatprep.mubr.f32.mxu1 %v241_v12  ;;  %v776_v21 = vpack.c.bf16 %v288_v10, %v287_v7 }
  0x20   : > { %763 = vmatprep.subr.bf16.mxu0 %v762_v38  ;;  %v306_v17 = vld [vmem:[%s1245_s2 + $0x1e8] sm:$0xff]  ;;  %v276_v19 = vld [vmem:[%s1245_s2 + $0xf8] sm:$0xff]  ;;  %v748_v22 = vpack.c.bf16 %v258_v15, %v257_v11  ;;  %v289_v23 = vld [vmem:[%s1245_s2 + $0x160] sm:$0xff] }
  0x21   : > { %741 = vmatpush3.bf16.msra.mxu1 %v740_v60  ;;  %v243_v20 = vld [vmem:[%s1127_s13 + $0x18] sm:$0xff]  ;;  %v778_v24 = vpack.c.bf16 %v306_v17, %v305_v16  ;;  %v750_v25 = vpack.c.bf16 %v276_v19, %v275_v18  ;;  %v290_v26 = vld [vmem:[%s1245_s2 + $0x168] sm:$0xff]  ;;  %v259_v27 = vld [vmem:[%s1245_s2 + $0x70] sm:$0xff] }
  0x22   : > { %743 = vmatprep.subr.bf16.mxu1 %v742_v0  ;;  %518 = vmatprep.mubr.f32.mxu0 %v243_v20  ;;  %v260_v28 = vld [vmem:[%s1245_s2 + $0x78] sm:$0xff]  ;;  %v307_v29 = vld [vmem:[%s1245_s2 + $0x1f0] sm:$0xff]  ;;  %v780_v31 = vpack.c.bf16 %v290_v26, %v289_v23  ;;  %v240_v36 = vld [vmem:[%s1127_s13] sm:$0xff] }
  0x23   : > { %765 = vmatpush3.bf16.msra.mxu0 %v764_v47  ;;  %v308_v30 = vld [vmem:[%s1245_s2 + $0x1f8] sm:$0xff]  ;;  %v752_v32 = vpack.c.bf16 %v260_v28, %v259_v27  ;;  %v291_v34 = vld [vmem:[%s1245_s2 + $0x170] sm:$0xff]  ;;  %v639_v48 = vld [vmem:[%s1247_s4] ss:$0 sm:$0xff] }
  0x24   : > { %767 = vmatprep.subr.bf16.mxu0 %v766_v51  ;;  %v782_v33 = vpack.c.bf16 %v308_v30, %v307_v29  ;;  %v292_v35 = vld [vmem:[%s1245_s2 + $0x178] sm:$0xff]  ;;  %v242_v38 = vld [vmem:[%s1127_s13 + $0x10] sm:$0xff]  ;;  %s228_s13 = sand.u32 1, %s885_s19  }
  0x25   : > { %745 = vmatpush3.bf16.msra.mxu1 %v744_v9  ;;  %v784_v37 = vpack.c.bf16 %v292_v35, %v291_v34  ;;  %s634_s8 = sshll.u32 %s228_s13, 3  ;;  %s546_s14 = scalar_lea.sflag [#allocation3], %s228_s13 }
  0x26   : > { %747 = vmatprep.subr.bf16.mxu1 %v746_v14  ;;  %s230_s10 = scalar_lea.vmem [#allocation2], %s634_s8 }
  0x27   : > { %769 = vmatpush3.bf16.msra.mxu0 %v768_v59  ;;  %s559_s11 = sshll.u32 %s230_s10, 4  ;;  %s1202_s11 = int_to_ptr.vmem [resolvable:$true] %s559_s11 }
  0x28   : > { %771 = vmatprep.subr.bf16.mxu0 %v770_v63  ;;  %s831_s23 = scalar_lea.vmem %s1202_s11, 128  ;;  %p838_p0 = scmp.lt.s32.totalorder %s1202_s11, %s836_s26 }
  0x29   : > { %749 = vmatpush3.bf16.msra.mxu1 %v748_v22  ;;  %p832_p11 = scmp.ne.s32.totalorder %s1202_s11, %s831_s23  ;;  %p839_p1 = scmp.lt.s32.totalorder %s837_s30, %s831_s23 }
  0x2a   : > { %751 = vmatprep.subr.bf16.mxu1 %v750_v25 }
  0x2b   : > { %773 = vmatpush3.bf16.msra.mxu0 %v772_v8  ;;  %p833_p12 = pnand %p832_p11, %p966_p5  ;;  %p840_p2 = por %p839_p1, %p838_p0 }
  0x2c   : > { %775 = vmatprep.subr.bf16.mxu0 %v774_v13 }
  0x2d   : > { %753 = vmatpush3.bf16.msra.mxu1 %v752_v32  ;;  %p834_p13 = pneg %p833_p12 }
  0x2f   : > { %777 = vmatpush3.bf16.msra.mxu0 %v776_v21  ;;  %p841_p3 = pnand %p840_p2, %p834_p13 }
  0x30   : > { %779 = vmatprep.subr.bf16.mxu0 %v778_v24  ;;  %449 = vmatmul.mubr.f32.vlgmr.msra.gmra.mrb[0].mxu1 %v240_v36 }
  0x33   : > { %781 = vmatpush3.bf16.msra.mxu0 %v780_v31 }
  0x34   : > { %783 = vmatprep.subr.bf16.mxu0 %v782_v33 }
  0x37   : > { %785 = vmatpush3.bf16.msra.mxu0 %v784_v37 }
  0x3a   : > { %519 = vmatmul.mubr.f32.vlgmr.msra.gmra.mrb[2].mxu0 %v242_v38 }
  0xed   : > { %v380_v39 = vpop.f32.mrb[0].mxu0 }
  0xee   : > { %v721_v40 = vpop.f32.mrb[1].mxu0 }
 0x103   : > { %v679_v41 = vpop.f32.mrb[0].mxu1 }
 0x104   : > { %v680_v42 = vpop.f32.mrb[1].mxu1 }
 0x105   : > { %v681_v43 = vadd.f32 %v680_v42, %v679_v41 }
 0x107   : > { %v451_v44 = vadd.f32 %v681_v43, %v380_v39 }
 0x10d   : > { %v714_v45 = vpop.f32.mrb[2].mxu0 }
 0x10e   : > { %v715_v46 = vpop.f32.mrb[3].mxu0 }
 0x10f   : > { %v716_v47 = vadd.f32 %v715_v46, %v714_v45 }
 0x111   : > { %v521_v49 = vadd.f32 %v716_v47, %v451_v44 }
 0x113   : > { %v531_v50 = vadd.f32 %v639_v48, %v521_v49 }
 0x115   : > { %v533_v51 = vsel %vm532_vm2, %v531_v50, -inf }
 0x116   : > { %534 = vmax.xlane.f32.xlu0 %v533_v51 }
 0x1a3   : > { %v535_v52 = vpop.xlane.xlu0 %534 }
 0x1a4   : > { %v536_v53 = vsub.f32 %v531_v50, %v535_v52 }
 0x1a6   : > { %v537_v54 = vmul.f32 1.442695, %v536_v53 }
 0x1a8   : > { %827 = vpow2.f32 %v537_v54 }
 0x1b2   : > { %v828_v55 = vpop.eup %827 }
 0x1b3   : > { %v539_v56 = vsel %vm532_vm2, %v828_v55, 0.0 }
 0x1b4   : > { %540 = vadd.xlane.f32.xlu0 %v539_v56 }
 0x241   : > { %v541_v57 = vpop.xlane.xlu0 %540 }
 0x242   : > { %829 = vrcp.f32 %v541_v57 }
 0x24c   : > { %v830_v58 = vpop.eup %829 }
 0x24d   : > { %v543_v59 = vmul.f32 %v830_v58, %v828_v55 }
 0x24f   : > { %544 = vst.msk [vmem:[%s230_s10] sm:$0xff] %vm532_vm2, %v543_v59 }
 0x250   : > { %844 = shalt.err (!%p841_p3)
}
 0x251   : > { %s845_s6 = scalar_lea.hbm %s1200_s16, 128  ;;  %s849_s25 = scalar_lea.hbm %s1248_s5, 256 }
 0x252   : > { %p846_p4 = scmp.ne.s32.totalorder %s1200_s16, %s845_s6  ;;  %p850_p9 = scmp.lt.u32.totalorder %s1200_s16, %s1248_s5 }
 0x253   : > { %p851_p10 = scmp.lt.u32.totalorder %s849_s25, %s845_s6  ;;  %p853_p12 = scmp.lt.u32.totalorder %s845_s6, %s1200_s16 }
 0x254   : > { %p847_p7 = pnand %p846_p4, %p966_p5 }
 0x255   : > { %p852_p11 = por %p851_p10, %p850_p9 }
 0x256   : > { %p848_p8 = pneg %p847_p7 }
 0x257   : > { %p854_p13 = por %p853_p12, %p852_p11 }
 0x259   : > { %p855_p0 = pnand %p854_p13, %p848_p8 }
 0x25b   : > { %858 = shalt.err (!%p855_p0)
}
 0x25c   : > { %786 = dma.vmem_to_hbm [thread:$0]  (%p966_p5), %s1202_s11, 128, %s1200_s16, %s546_s14  }
 0x25d PF: > { %p792_p1 = scmp.ge.s32.totalorder %s893_s21, 2  ;;  %s571_s9 = sand.u32 1, %s881_s18  }
 0x25e   : > { %s572_s10 = scalar_lea.sflag [#allocation3], %s571_s9 }
 0x25f   : > { %p789_p2 = pnand %p792_p1, %p970_p6 }
 0x261   : > { %876 = dma.done.wait (!%p789_p2), %s572_s10, 128  }
 0x262   : > { %878 = vsyncadd (!%p789_p2), %s572_s10, 4294967168  ;;  %p15_p3 = scmp.ge.s32.totalorder %s953_s24, 4   ;;  %s1251_s18 = smov %s885_s19 }
 0x263   : > { %s1252_s19 = smov %s889_s20  ;;  %s1253_s20 = smov %s964_s27 }
 0x264   : > { %s1254_s21 = smov %s953_s24  ;;  %17 = sbr.rel (!%p15_p3) target bundleno = 3 (0x3), region = 78 }
 0x26b   :  { %577 = vsyncpa [#allocation3], 1 }
 0x26c   :  { %579 = vsyncpa [#allocation3 + $0x1], 1 }

</bundles_post_ra>
